<compile_context>
chip_gen: v7x
topology: tpu7x:2x2x1
jax: 0.10.0
libtpu: 0.0.40
codegen_flags: <defaults>
</compile_context>

<pallas_src>
import jax
import jax.numpy as jnp
from jax import lax
from jax.experimental import pallas as pl
from jax.experimental.pallas import tpu as pltpu


_PROJ = 256  # hidden projection width (nn.Linear(H, 256))


def _round_up(x, m):
    return (x + m - 1) // m * m


def _span_ner_head_kernel(x_ref, wh_ref, wc_ref, bc_ref, out_ref):
    # hidden = Linear(H -> 256); bias folded into the classifier bias;
    # Dropout(0.1) is identity at inference.
    x = x_ref[...].astype(jnp.bfloat16)  # cast in-register, no extra HBM pass
    h = jnp.dot(x, wh_ref[...], preferred_element_type=jnp.float32)  # (tile_m, 256) f32
    # Fused [start | end | type | pad] classifier, emitted transposed:
    # (c_sub, 256) x (tile_m, 256)^T -> (c_sub, tile_m).  Channels live on the
    # sublanes, rows on the lane axis -> lane-dense unmasked stores.
    logits_t = lax.dot_general(
        wc_ref[...], h.astype(jnp.bfloat16),
        dimension_numbers=(((1,), (1,)), ((), ())),
        preferred_element_type=jnp.float32)
    out_ref[...] = logits_t + bc_ref[...]


def prepare_head_params(params):
    """Fold the 3 heads + hidden bias into one fused classifier.

    Runs once at parameter-load time (hoisted out of the per-forward path),
    so the hot path sees weights already fused and already bf16 in HBM.
    """
    H, proj = params["w_hidden"].shape
    T = params["w_type"].shape[1]
    c_sub = _round_up(2 + T, 8)  # channels padded to a sublane multiple

    w_cls = jnp.zeros((proj, c_sub), jnp.float32)
    w_cls = w_cls.at[:, 0:1].set(params["w_start"])
    w_cls = w_cls.at[:, 1:2].set(params["w_end"])
    w_cls = w_cls.at[:, 2:2 + T].set(params["w_type"])
    b_cls = jnp.zeros((1, c_sub), jnp.float32)
    b_cls = b_cls.at[:, 0:1].set(params["b_start"])
    b_cls = b_cls.at[:, 1:2].set(params["b_end"])
    b_cls = b_cls.at[:, 2:2 + T].set(params["b_type"])

    # (x@Wh + bh)@Wc + bc  ==  x@Wh@Wc + (bh@Wc + bc)   -> fold bh in f32.
    b_fused = b_cls + params["b_hidden"].astype(jnp.float32) @ w_cls  # (1, c_sub)

    return {
        "w_hidden_bf16": params["w_hidden"].astype(jnp.bfloat16),  # (H, 256)
        "w_cls_t_bf16": w_cls.T.astype(jnp.bfloat16),              # (c_sub, 256)
        "b_fused_t": b_fused.T,                                    # (c_sub, 1) f32
        "num_types": T,
    }


def _choose_tile_m(M, tile_m):
    if M < 256:
        # Single block covering everything: block dims == full array dims, so
        # the (8,128) constraint is satisfied without any padding.
        return M, 1
    # Lane-dense tiles (multiple of 128) and >= 2 grid steps so the "parallel"
    # axis shards across both v7x TensorCores.
    cap = _round_up(pl.cdiv(M, 2), 128)
    tile_m = _round_up(max(128, min(tile_m, cap)), 128)
    return tile_m, pl.cdiv(M, tile_m)


def span_ner_forward(sequence_output, head, tile_m=1024):
    """sequence_output: (B, S, H) encoder output (f32 or bf16).

    head: output of prepare_head_params().
    Returns (start_logits (B,S), end_logits (B,S), type_logits (B,S,T)),
    matching the PyTorch forward's no-label branch.
    """
    B, S, H = sequence_output.shape
    M = B * S
    T = head["num_types"]
    wh = head["w_hidden_bf16"]
    wc_t = head["w_cls_t_bf16"]
    b_t = head["b_fused_t"]
    proj = wh.shape[1]
    c_sub = wc_t.shape[0]

    x2d = sequence_output.reshape(M, H)  # metadata-only reshape, no HBM copy
    tile_m, grid_m = _choose_tile_m(M, tile_m)

    x_bytes = jnp.dtype(sequence_output.dtype).itemsize
    flops = 2 * M * (H * proj + proj * c_sub)
    bytes_accessed = (M * H * x_bytes + c_sub * M * 4
                      + (H * proj + c_sub * proj) * 2 + c_sub * 4)
    est_vmem = (2 * tile_m * H * x_bytes + 2 * c_sub * tile_m * 4
                + 2 * (H * proj + c_sub * proj) * 2 + 2 * c_sub * 4)
    vmem_limit = int(min(max(2 * est_vmem, 32 * 1024 * 1024), 64 * 1024 * 1024))

    out = pl.pallas_call(
        _span_ner_head_kernel,
        out_shape=jax.ShapeDtypeStruct((c_sub, M), jnp.float32),
        grid=(grid_m,),
        in_specs=[
            pl.BlockSpec((tile_m, H), lambda i: (i, 0)),     # x, streamed row tiles
            pl.BlockSpec((H, proj), lambda i: (0, 0)),       # hidden weight, resident
            pl.BlockSpec((c_sub, proj), lambda i: (0, 0)),   # fused classifier (transposed)
            pl.BlockSpec((c_sub, 1), lambda i: (0, 0)),      # fused bias
        ],
        out_specs=pl.BlockSpec((c_sub, tile_m), lambda i: (0, i)),
        compiler_params=pltpu.CompilerParams(
            dimension_semantics=("parallel",),
            vmem_limit_bytes=vmem_limit),
        cost_estimate=pl.CostEstimate(
            flops=flops, transcendentals=0, bytes_accessed=bytes_accessed),
    )(x2d, wh, wc_t, b_t)

    # Channels are contiguous rows of the small (c_sub, M) buffer.
    start_logits = out[0].reshape(B, S)          # .squeeze(-1) equivalent
    end_logits = out[1].reshape(B, S)
    type_logits = out[2:2 + T].T.reshape(B, S, T)
    return start_logits, end_logits, type_logits


def init_params(key, bert_hidden, proj=256, num_types=5):
    ks = jax.random.split(key, 8)
    scale = 0.02
    return {
        "w_hidden": scale * jax.random.normal(ks[0], (bert_hidden, proj), jnp.float32),
        "b_hidden": scale * jax.random.normal(ks[1], (1, proj), jnp.float32),
        "w_type":   scale * jax.random.normal(ks[2], (proj, num_types), jnp.float32),
        "b_type":   scale * jax.random.normal(ks[3], (1, num_types), jnp.float32),
        "w_start":  scale * jax.random.normal(ks[4], (proj, 1), jnp.float32),
        "b_start":  scale * jax.random.normal(ks[5], (1, 1), jnp.float32),
        "w_end":    scale * jax.random.normal(ks[6], (proj, 1), jnp.float32),
        "b_end":    scale * jax.random.normal(ks[7], (1, 1), jnp.float32),
    }


def _reference(seq_out, params):
    B, S, H = seq_out.shape
    T = params["w_type"].shape[1]
    x2d = seq_out.reshape(B * S, H)
    h = x2d @ params["w_hidden"] + params["b_hidden"]
    r_start = (h @ params["w_start"] + params["b_start"]).reshape(B, S)
    r_end = (h @ params["w_end"] + params["b_end"]).reshape(B, S)
    r_type = (h @ params["w_type"] + params["b_type"]).reshape(B, S, T)
    return r_start, r_end, r_type


if __name__ == "__main__":
    key = jax.random.PRNGKey(0)

    # --- small shapes (single-block path) ---
    B, S, H, T = 2, 8, 32, 5
    k_seq, k_par, key = jax.random.split(key, 3)
    seq_out = jax.random.normal(k_seq, (B, S, H), jnp.float32)
    params = init_params(k_par, bert_hidden=H, proj=256, num_types=T)
    head = prepare_head_params(params)

    start_logits, end_logits, type_logits = span_ner_forward(seq_out, head)
    jax.block_until_ready((start_logits, end_logits, type_logits))

    rs, re, rt = _reference(seq_out, params)
    assert start_logits.shape == (B, S)
    assert end_logits.shape == (B, S)
    assert type_logits.shape == (B, S, T)
    assert jnp.allclose(start_logits, rs, atol=2e-2, rtol=5e-2)
    assert jnp.allclose(end_logits, re, atol=2e-2, rtol=5e-2)
    assert jnp.allclose(type_logits, rt, atol=2e-2, rtol=5e-2)

    # --- larger shapes: exercises the streamed, 2-step "parallel" grid path ---
    B2, S2, H2 = 2, 256, 64
    k_seq2, k_par2, key = jax.random.split(key, 3)
    seq_out2 = jax.random.normal(k_seq2, (B2, S2, H2), jnp.float32)
    params2 = init_params(k_par2, bert_hidden=H2, proj=256, num_types=T)
    head2 = prepare_head_params(params2)

    s2, e2, t2 = span_ner_forward(seq_out2, head2)
    jax.block_until_ready((s2, e2, t2))

    rs2, re2, rt2 = _reference(seq_out2, params2)
    assert jnp.allclose(s2, rs2, atol=2e-2, rtol=5e-2)
    assert jnp.allclose(e2, re2, atol=2e-2, rtol=5e-2)
    assert jnp.allclose(t2, rt2, atol=2e-2, rtol=5e-2)

    print("KERNEL_OK")
</pallas_src>

<mosaic_0001>
module attributes {stable_mosaic.version = 11 : i64} {
  func.func @_span_ner_head_kernel(%arg0: i32, %arg1: memref<16x32xf32, #tpu.memory_space<vmem>>, %arg2: memref<32x256xbf16, #tpu.memory_space<vmem>>, %arg3: memref<8x256xbf16, #tpu.memory_space<vmem>>, %arg4: memref<8x1xf32, #tpu.memory_space<vmem>>, %arg5: memref<8x16xf32, #tpu.memory_space<vmem>>) attributes {dimension_semantics = [#tpu.dimension_semantics<parallel>], iteration_bounds = array<i64: 1>, scalar_prefetch = 0 : i64, scratch_operands = 0 : i64, tpu.core_type = #tpu.core_type<tc>, window_params = [{transform_indices = @transform_0, window_bounds = array<i64: 16, 32>}, {pipeline_mode = #tpu.pipeline_mode<synchronous>, transform_indices = @transform_1, window_bounds = array<i64: 32, 256>}, {pipeline_mode = #tpu.pipeline_mode<synchronous>, transform_indices = @transform_2, window_bounds = array<i64: 8, 256>}, {pipeline_mode = #tpu.pipeline_mode<synchronous>, transform_indices = @transform_3, window_bounds = array<i64: 8, 1>}, {transform_indices = @transform_4, window_bounds = array<i64: 8, 16>}]} {
    %c0 = arith.constant 0 : index
    %c0_0 = arith.constant 0 : index
    %0 = vector.load %arg1[%c0, %c0_0] : memref<16x32xf32, #tpu.memory_space<vmem>>, vector<16x32xf32>
    %1 = arith.truncf %0 : vector<16x32xf32> to vector<16x32xbf16>
    %c0_1 = arith.constant 0 : index
    %c0_2 = arith.constant 0 : index
    %2 = vector.load %arg2[%c0_1, %c0_2] : memref<32x256xbf16, #tpu.memory_space<vmem>>, vector<32x256xbf16>
    %cst = arith.constant dense<0.000000e+00> : vector<16x256xf32>
    %3 = tpu.matmul %1, %2, %cst {dimension_numbers = #tpu.dot_dimension_numbers<[1], [0], [0], [1], [0, 0, 1, 1], [], []>} : vector<16x32xbf16>, vector<32x256xbf16>, vector<16x256xf32> -> vector<16x256xf32>
    %c0_3 = arith.constant 0 : index
    %c0_4 = arith.constant 0 : index
    %4 = vector.load %arg3[%c0_3, %c0_4] : memref<8x256xbf16, #tpu.memory_space<vmem>>, vector<8x256xbf16>
    %5 = arith.truncf %3 : vector<16x256xf32> to vector<16x256xbf16>
    %cst_5 = arith.constant dense<0.000000e+00> : vector<8x16xf32>
    %6 = tpu.matmul %4, %5, %cst_5 {dimension_numbers = #tpu.dot_dimension_numbers<[1], [1], [0], [0], [0, 0, 1, 0], [], []>} : vector<8x256xbf16>, vector<16x256xbf16>, vector<8x16xf32> -> vector<8x16xf32>
    %c0_6 = arith.constant 0 : index
    %c0_7 = arith.constant 0 : index
    %7 = vector.load %arg4[%c0_6, %c0_7] : memref<8x1xf32, #tpu.memory_space<vmem>>, vector<8x1xf32>
    %8 = vector.broadcast %7 : vector<8x1xf32> to vector<8x16xf32>
    %9 = arith.addf %6, %8 : vector<8x16xf32>
    %c0_8 = arith.constant 0 : index
    %c0_9 = arith.constant 0 : index
    %10 = vector.load %arg5[%c0_8, %c0_9] : memref<8x16xf32, #tpu.memory_space<vmem>>, vector<8x16xf32>
    tpu.vector_store %arg5[%c0_8, %c0_9], %9 {strides = array<i32>} : memref<8x16xf32, #tpu.memory_space<vmem>>, vector<8x16xf32>,
    return
  }
  func.func @transform_0(%arg0: i32) -> (i32, i32) {
    %c0_i32 = arith.constant 0 : i32
    %c0_i32_0 = arith.constant 0 : i32
    return %arg0, %c0_i32 : i32, i32
  }
  func.func @transform_1(%arg0: i32) -> (i32, i32) {
    %c0_i32 = arith.constant 0 : i32
    %c0_i32_0 = arith.constant 0 : i32
    %c0_i32_1 = arith.constant 0 : i32
    return %c0_i32, %c0_i32_0 : i32, i32
  }
  func.func @transform_2(%arg0: i32) -> (i32, i32) {
    %c0_i32 = arith.constant 0 : i32
    %c0_i32_0 = arith.constant 0 : i32
    %c0_i32_1 = arith.constant 0 : i32
    return %c0_i32, %c0_i32_0 : i32, i32
  }
  func.func @transform_3(%arg0: i32) -> (i32, i32) {
    %c0_i32 = arith.constant 0 : i32
    %c0_i32_0 = arith.constant 0 : i32
    %c0_i32_1 = arith.constant 0 : i32
    return %c0_i32, %c0_i32_0 : i32, i32
  }
  func.func @transform_4(%arg0: i32) -> (i32, i32) {
    %c0_i32 = arith.constant 0 : i32
    %c0_i32_0 = arith.constant 0 : i32
    return %c0_i32, %arg0 : i32, i32
  }
}

</mosaic_0001>

<bundles_post_ra>
// kernel: tpu_custom_call.1
= control target key start
LH: loop header
LB: loop body
LE: loop exit
PB: predicated region body
PF: predicated region fallthrough
CT: control target
= control target key end

     0   :  { %9 = vsyncpa [#allocation3], 0  ;;  %s362_s0 = inlined_call_operand.hbm [shape: f32[16,32], index: 0, kind: input, shape index: {}]   ;;  %s363_s1 = inlined_call_operand.hbm [shape: bf16[32,256], index: 1, kind: input, shape index: {}]   ;;  %s364_s2 = inlined_call_operand.vmem [shape: bf16[8,256], index: 2, kind: input, shape index: {}]   ;;  %s365_s3 = inlined_call_operand.vmem [shape: f32[8,1], index: 3, kind: input, shape index: {}]   ;;  %s366_s4 = inlined_call_operand.hbm [shape: f32[8,16], index: 4, kind: output, shape index: {}]  }
   0x1   :  { %10 = vsyncpa [#allocation6], 0 }
   0x2   :  { %11 = vsyncpa [#allocation4], 0  ;;  %s289_s15 = smov [#allocation2]   ;;  %s217_s19 = scalar_lea.hbm %s362_s0, 256 }
   0x3   :  { %s17_s16 = sshll.u32 %s289_s15, 4  ;;  %p218_p0 = scmp.ne.s32.totalorder %s362_s0, %s217_s19  ;;  %s18_s16 = int_to_ptr.vmem [resolvable:$true] %s17_s16 }
   0x4   :  { %p221_p1 = scmp.lt.u32.totalorder %s217_s19, %s362_s0 }
   0x6   :  { %p223_p2 = pnand %p221_p1, %p218_p0 }
   0x8   :  { %226 = shalt.err (!%p223_p2)
}
   0x9   :  { %s227_s24 = scalar_lea.vmem %s18_s16, 256  ;;  %p232_p4 = scmp.lt.s32.totalorder %s18_s16, %s18_s16 }
   0xa   :  { %p228_p3 = scmp.ne.s32.totalorder %s18_s16, %s227_s24  ;;  %p233_p5 = scmp.lt.s32.totalorder %s227_s24, %s227_s24 }
   0xc   :  { %p234_p6 = por %p233_p5, %p232_p4 }
   0xe   :  { %p235_p7 = pnand %p234_p6, %p228_p3 }
  0x10   :  { %238 = shalt.err (!%p235_p7)
}
  0x11   :  { %s290_s25 = smov 128   ;;  %s291_s26 = smov 8  }
  0x12   :  { %23 = dma.hbm_to_vmem [thread:$0]  %s362_s0, 256, %s18_s16, [#allocation3], %s290_s25, %s290_s25, %s291_s26  }
  0x13   :  { %s292_s29 = smov [#allocation5]   ;;  %s239_s7 = scalar_lea.hbm %s363_s1, 512 }
  0x14   :  { %s29_s30 = sshll.u32 %s292_s29, 4  ;;  %p240_p8 = scmp.ne.s32.totalorder %s363_s1, %s239_s7  ;;  %s30_s30 = int_to_ptr.vmem [resolvable:$true] %s29_s30 }
  0x15   :  { %p243_p9 = scmp.lt.u32.totalorder %s239_s7, %s363_s1 }
  0x17   :  { %p245_p10 = pnand %p243_p9, %p240_p8 }
  0x19   :  { %248 = shalt.err (!%p245_p10)
}
  0x1a   :  { %s249_s12 = scalar_lea.vmem %s30_s30, 512  ;;  %p254_p12 = scmp.lt.s32.totalorder %s30_s30, %s30_s30 }
  0x1b   :  { %p250_p11 = scmp.ne.s32.totalorder %s30_s30, %s249_s12  ;;  %p255_p13 = scmp.lt.s32.totalorder %s249_s12, %s249_s12 }
  0x1d   :  { %p256_p0 = por %p255_p13, %p254_p12 }
  0x1f   :  { %p257_p1 = pnand %p256_p0, %p250_p11 }
  0x21   :  { %260 = shalt.err (!%p257_p1)
}
  0x22   :  { %35 = dma.hbm_to_vmem [thread:$0]  %s363_s1, 512, %s30_s30, [#allocation6], %s290_s25, %s290_s25, %s291_s26  }
  0x23   :  { %283 = dma.done.wait [#allocation3], 256  }
  0x24   :  { %284 = vsyncadd [#allocation3], 4294967040 }
  0x25   :  { %285 = dma.done.wait [#allocation6], 512  }
  0x26   :  { %286 = vsyncadd [#allocation6], 4294966784  ;;  %v293_v0 = vmov 0   ;;  %v209_v1 = vld [vmem:[#allocation5 + $0x4] ss:$8 sps:$4 sm:$0xff]   ;;  %v47_v5 = vld [vmem:[#allocation2] sm:$0xff] }
  0x27   :  { %110 = vmatprep.mubr.bf16.mxu0 %v293_v0  ;;  %208 = vset.pattern.permute.xlu0 %v293_v0  ;;  %v211_v2 = vld [vmem:[#allocation5] ss:$8 sps:$4 sm:$0xff]   ;;  %v212_v3 = vld [vmem:[#allocation5 + $0x14] ss:$8 sps:$4 sm:$0xff]   ;;  %v214_v4 = vld [vmem:[#allocation5 + $0x10] ss:$8 sps:$4 sm:$0xff]  }
  0x28   :  { %78 = vmatprep.subr.bf16.mxu0 %v209_v1  ;;  %v48_v6 = vld [vmem:[#allocation2 + $0x8] sm:$0xff]  ;;  %vm74_vm0 = vcmask 261120   ;;  %v121_v8 = vld [vmem:[%s364_s2] sm:$0xff]  ;;  %s294_s17 = smov [#allocation7]   ;;  %vm177_vm1 = vcmask 130048  }
  0x29   :  { %79 = vmatpush1.bf16.msra.mxu0 %v211_v2  ;;  %v49_v7 = vpack.c.bf16 %v48_v6, %v47_v5  ;;  %v201_v9 = vcombine.high %v121_v8, %v121_v8  ;;  %v124_v10 = vld [vmem:[%s365_s3] sm:$0xff]  ;;  %v200_v17 = vcombine.low %v121_v8, %v121_v8  ;;  %s185_s2 = sshll.u32 %s294_s17, 4  ;;  %s186_s2 = int_to_ptr.vmem [resolvable:$true] %s185_s2 }
  0x2a   :  { %80 = vmatprep.subr.bf16.mxu0 %v212_v3  ;;  %127 = vperm.xlu0 %208, %v124_v10   ;;  %s261_s3 = scalar_lea.vmem %s186_s2, 128  ;;  %p266_p3 = scmp.lt.s32.totalorder %s186_s2, %s186_s2 }
  0x2b   :  { %169 = vmatprep.mubr.bf16.mxu1 %v201_v9  ;;  %p262_p2 = scmp.ne.s32.totalorder %s186_s2, %s261_s3  ;;  %p267_p4 = scmp.lt.s32.totalorder %s261_s3, %s261_s3 }
  0x2d   :  { %81 = vmatpush1.bf16.msra.mxu0 %v214_v4  ;;  %p268_p5 = por %p267_p4, %p266_p3 }
  0x2f   :  { %p269_p6 = pnand %p268_p5, %p262_p2 }
  0x30   :  { %199 = vmatmul.mubr.msk.bf16.vlgmr.msra.gmra.mrb[0].mxu0 %vm74_vm0, %v49_v7 }
  0xa9   :  { %v128_v18 = vpop.permute.xlu0 %127 }
 0x103   :  { %v112_v11 = vpop.f32.mrb[0].mxu0 }
 0x104   :  { %v114_v12 = vpop.f32.mrb[1].mxu0 }
 0x105   :  { %v116_v13 = vpop.f32.mrb[2].mxu0 }
 0x106   :  { %v122_v14 = vpack.c.bf16 %v116_v13, %v112_v11  ;;  %v118_v15 = vpop.f32.mrb[3].mxu0 }
 0x107   :  { %v123_v16 = vpack.c.bf16 %v118_v15, %v114_v12 }
 0x109   :  { %137 = vmatprep.subr.bf16.mxu1 %v123_v16 }
 0x10a   :  { %138 = vmatpush1.bf16.xpose.msra.mxu1 %v122_v14 }
 0x111   :  { %170 = vmatmul.mubr.bf16.vlgmr.msra.gmra.mrb[0].mxu1 %v200_v17 }
 0x1e4   :  { %v171_v19 = vpop.f32.mrb[0].mxu1 }
 0x1e5   :  { %v172_v20 = vadd.f32 %v171_v19, %v128_v18  ;;  %v173_v21 = vpop.f32.mrb[1].mxu1 }
 0x1e6   :  { %v174_v22 = vpop.f32.mrb[2].mxu1 }
 0x1e7   :  { %v175_v23 = vpop.f32.mrb[3].mxu1  ;;  %178 = vst.msk [vmem:[#allocation7] sm:$0xff] %vm177_vm1, %v172_v20 }
 0x1e8   :  { %272 = shalt.err (!%p269_p6)
}
 0x1e9   :  { %s273_s20 = scalar_lea.hbm %s366_s4, 128 }
 0x1ea   :  { %p274_p7 = scmp.ne.s32.totalorder %s366_s4, %s273_s20  ;;  %p277_p8 = scmp.lt.u32.totalorder %s273_s20, %s366_s4 }
 0x1ec   :  { %p279_p9 = pnand %p277_p8, %p274_p7 }
 0x1ee   :  { %282 = shalt.err (!%p279_p9)
}
 0x1ef   :  { %188 = dma.vmem_to_hbm [thread:$0]  %s186_s2, 128, %s366_s4, [#allocation4]  }
 0x1f0   :  { %287 = dma.done.wait [#allocation4], 128  }
 0x1f1   :  { %288 = vsyncadd [#allocation4], 4294967168 }
 0x1f2   :  { %192 = vsyncpa [#allocation3], 1 }
 0x1f3   :  { %193 = vsyncpa [#allocation6], 1 }
 0x1f4   :  { %194 = vsyncpa [#allocation4], 1 }

</bundles_post_ra>
